<compile_context>
chip_gen: v6e
topology: v6e:2x2x1
jax: 0.10.0
libtpu: 0.0.40
codegen_flags: <defaults>
</compile_context>

<pallas_src>
import math

import jax
import jax.numpy as jnp
from jax.experimental import pallas as pl
from jax.experimental.pallas import tpu as pltpu


def _round_up(n: int, m: int) -> int:
    return ((n + m - 1) // m) * m


def groupwise_linear_kernel(x_ref, w_ref, b_ref, o_ref, acc_ref):
    # x_ref: (TB, TC, TD)  w_ref: (TC, TD)  b_ref: (1, TC)
    # o_ref: (TB, TC)      acc_ref: (TB, TC) f32 scratch
    k = pl.program_id(2)

    @pl.when(k == 0)
    def _():
        acc_ref[...] = jnp.zeros_like(acc_ref)

    x = x_ref[...]
    w = w_ref[...]
    # Multiply in the input dtype (bf16 VPU on v6e/v7x), accumulate in f32.
    prod = (x * w[None, :, :]).astype(jnp.float32)
    acc_ref[...] += jnp.sum(prod, axis=-1)            # (TB, TC) lane reduction

    @pl.when(k == pl.num_programs(2) - 1)
    def _():
        s = acc_ref[...] + b_ref[...].astype(jnp.float32)   # (1, TC) broadcasts
        o_ref[...] = s.astype(o_ref.dtype)


def groupwise_linear(x, W, b=None, *, max_block_bytes=4 * 1024 * 1024):
    """x: (B, C, D); W: (1, C, D); b: (1, C) or None -> (B, C)."""
    B, C, D = x.shape
    itemsize = jnp.dtype(x.dtype).itemsize
    if b is None:
        b = jnp.zeros((1, C), dtype=x.dtype)

    # --- class tiling: lane-dense output ------------------------------------
    if C >= 128:
        C_pad = _round_up(C, 128)
        TC = 128                        # unmasked stores for the (TB, TC) tile
    else:
        C_pad = _round_up(C, 8)         # sublane multiple for the x block
        TC = C_pad                      # single full-width class tile

    # --- hidden-dim chunking (only if a minimal TB=8 block would be too big) --
    TD, n_d = D, 1
    min_block_bytes = 8 * TC * D * itemsize
    if min_block_bytes > max_block_bytes and D % 128 == 0:
        cap_td = max(128, (max_block_bytes // (8 * TC * itemsize)) // 128 * 128)
        best_td = 128
        t = 128
        while t <= min(cap_td, D):
            if D % t == 0:              # only divisors -> no hidden-dim padding
                best_td = t
            t += 128
        TD, n_d = best_td, D // best_td

    # --- batch tiling: multiple of 8 sublanes, minimize batch padding --------
    row_bytes = TC * TD * itemsize
    tb_cap = max(8, (max_block_bytes // row_bytes) // 8 * 8)
    B8 = _round_up(B, 8)
    TB, best_rows = 8, _round_up(B, 8)
    for t in range(8, min(tb_cap, B8) + 1, 8):
        rows = _round_up(B, t)
        if rows < best_rows or (rows == best_rows and t > TB):
            TB, best_rows = t, rows
    B_pad = _round_up(B, TB)

    # --- pad operands (plain-JAX glue; padded rows/cols sliced off below) ----
    w2d = W.reshape(C, D)
    b2d = b.reshape(1, C)
    if C_pad != C:
        w2d = jnp.pad(w2d, ((0, C_pad - C), (0, 0)))
        b2d = jnp.pad(b2d, ((0, 0), (0, C_pad - C)))
    x_p = x
    if B_pad != B or C_pad != C:
        x_p = jnp.pad(x, ((0, B_pad - B), (0, C_pad - C), (0, 0)))

    # class OUTER, batch MIDDLE (W block index constant over it -> resident),
    # hidden-dim chunk INNERMOST (reduction).
    grid = (C_pad // TC, B_pad // TB, n_d)

    # VMEM budget: double-buffered x/W/b/out blocks + f32 accumulator + margin.
    est = (2 * TB * TC * TD + 2 * TC * TD + 2 * TB * TC) * itemsize \
        + 2 * 8 * 128 * itemsize + TB * TC * 4
    vmem_limit = min(max(int(est * 1.5) + (4 << 20), 16 << 20), 100 << 20)

    out = pl.pallas_call(
        groupwise_linear_kernel,
        out_shape=jax.ShapeDtypeStruct((B_pad, C_pad), x.dtype),
        grid=grid,
        in_specs=[
            pl.BlockSpec((TB, TC, TD), lambda j, i, k: (i, j, k)),   # x
            pl.BlockSpec((TC, TD), lambda j, i, k: (j, k)),          # W
            pl.BlockSpec((1, TC), lambda j, i, k: (0, j)),           # b
        ],
        out_specs=pl.BlockSpec((TB, TC), lambda j, i, k: (i, j)),
        scratch_shapes=[pltpu.VMEM((TB, TC), jnp.float32)],
        compiler_params=pltpu.CompilerParams(
            dimension_semantics=("parallel", "parallel", "arbitrary"),
            vmem_limit_bytes=vmem_limit),
    )(x_p, w2d, b2d)

    return out[:B, :C]


if __name__ == "__main__":
    key = jax.random.PRNGKey(0)

    def make_case(B, num_class, hidden_dim, seed_key, dtype=jnp.float32):
        kx, kw, kb = jax.random.split(seed_key, 3)
        # Mirrors reset_parameters(): uniform(-stdv, stdv), stdv = 1/sqrt(hidden_dim).
        stdv = 1.0 / math.sqrt(hidden_dim)
        W = jax.random.uniform(kw, (1, num_class, hidden_dim),
                               minval=-stdv, maxval=stdv, dtype=dtype)
        b = jax.random.uniform(kb, (1, num_class),
                               minval=-stdv, maxval=stdv, dtype=dtype)
        x = jax.random.normal(kx, (B, num_class, hidden_dim), dtype=dtype)
        return x, W, b

    k1, k2, k3 = jax.random.split(key, 3)

    # Case 1: small shapes consistent with the module's forward (single tile).
    x, W, b = make_case(2, 8, 32, k1)
    out = jax.block_until_ready(groupwise_linear(x, W, b))
    ref = (W * x).sum(-1) + b
    assert out.shape == (2, 8)
    assert jnp.allclose(out, ref, atol=1e-5, rtol=1e-5)

    # Case 2: exercises B/C padding, the lane-dense TC=128 path, multi-tile grid.
    x2, W2, b2 = make_case(5, 200, 128, k2)
    out2 = jax.block_until_ready(groupwise_linear(x2, W2, b2))
    ref2 = (W2 * x2).sum(-1) + b2
    assert out2.shape == (5, 200)
    assert jnp.allclose(out2, ref2, atol=1e-4, rtol=1e-4)

    # Case 3: forces the hidden-dim chunking / accumulator path (TD < D).
    x3, W3, b3 = make_case(4, 16, 256, k3)
    out3 = jax.block_until_ready(
        groupwise_linear(x3, W3, b3, max_block_bytes=64 * 1024))
    ref3 = (W3 * x3).sum(-1) + b3
    assert out3.shape == (4, 16)
    assert jnp.allclose(out3, ref3, atol=1e-4, rtol=1e-4)

    print("KERNEL_OK")
</pallas_src>

<mosaic_0001>
module attributes {stable_mosaic.version = 11 : i64} {
  func.func @groupwise_linear_kernel(%arg0: i32, %arg1: i32, %arg2: i32, %arg3: memref<8x8x32xf32, #tpu.memory_space<vmem>>, %arg4: memref<8x32xf32, #tpu.memory_space<vmem>>, %arg5: memref<1x8xf32, #tpu.memory_space<vmem>>, %arg6: memref<8x8xf32, #tpu.memory_space<vmem>>, %arg7: memref<8x8xf32, #tpu.memory_space<vmem>>) attributes {dimension_semantics = [#tpu.dimension_semantics<parallel>, #tpu.dimension_semantics<parallel>, #tpu.dimension_semantics<arbitrary>], iteration_bounds = array<i64: 1, 1, 1>, scalar_prefetch = 0 : i64, scratch_operands = 1 : i64, tpu.core_type = #tpu.core_type<tc>, window_params = [{transform_indices = @transform_0, window_bounds = array<i64: 8, 8, 32>}, {transform_indices = @transform_1, window_bounds = array<i64: 8, 32>}, {transform_indices = @transform_2, window_bounds = array<i64: 1, 8>}, {transform_indices = @transform_3, window_bounds = array<i64: 8, 8>}]} {
    %c0_i32 = arith.constant 0 : i32
    %0 = arith.cmpi eq, %arg2, %c0_i32 : i32
    %1 = arith.extui %0 : i1 to i32
    %c0_i32_0 = arith.constant 0 : i32
    %2 = arith.cmpi ne, %1, %c0_i32_0 : i32
    scf.if %2 {
      %cst_11 = arith.constant 0.000000e+00 : f32
      %15 = vector.broadcast %cst_11 : f32 to vector<8x8xf32>
      %c0_12 = arith.constant 0 : index
      %c0_13 = arith.constant 0 : index
      %16 = vector.load %arg7[%c0_12, %c0_13] : memref<8x8xf32, #tpu.memory_space<vmem>>, vector<8x8xf32>
      tpu.vector_store %arg7[%c0_12, %c0_13], %15 {strides = array<i32>} : memref<8x8xf32, #tpu.memory_space<vmem>>, vector<8x8xf32>,
    } else {
    }
    %c0 = arith.constant 0 : index
    %c0_1 = arith.constant 0 : index
    %c0_2 = arith.constant 0 : index
    %3 = vector.load %arg3[%c0, %c0_1, %c0_2] : memref<8x8x32xf32, #tpu.memory_space<vmem>>, vector<8x8x32xf32>
    %c0_3 = arith.constant 0 : index
    %c0_4 = arith.constant 0 : index
    %4 = vector.load %arg4[%c0_3, %c0_4] : memref<8x32xf32, #tpu.memory_space<vmem>>, vector<8x32xf32>
    %5 = vector.shape_cast %4 : vector<8x32xf32> to vector<1x8x32xf32>
    %6 = vector.broadcast %5 : vector<1x8x32xf32> to vector<8x8x32xf32>
    %7 = arith.mulf %3, %6 : vector<8x8x32xf32>
    %c0_5 = arith.constant 0 : index
    %c0_6 = arith.constant 0 : index
    %8 = vector.load %arg7[%c0_5, %c0_6] : memref<8x8xf32, #tpu.memory_space<vmem>>, vector<8x8xf32>
    %cst = arith.constant dense<0.000000e+00> : vector<8x8xf32>
    %9 = vector.multi_reduction <add>, %7, %cst [2] : vector<8x8x32xf32> to vector<8x8xf32>
    %10 = arith.addf %8, %9 : vector<8x8xf32>
    %c0_7 = arith.constant 0 : index
    %c0_8 = arith.constant 0 : index
    %11 = vector.load %arg7[%c0_7, %c0_8] : memref<8x8xf32, #tpu.memory_space<vmem>>, vector<8x8xf32>
    tpu.vector_store %arg7[%c0_7, %c0_8], %10 {strides = array<i32>} : memref<8x8xf32, #tpu.memory_space<vmem>>, vector<8x8xf32>,
    %c0_i32_9 = arith.constant 0 : i32
    %12 = arith.cmpi eq, %arg2, %c0_i32_9 : i32
    %13 = arith.extui %12 : i1 to i32
    %c0_i32_10 = arith.constant 0 : i32
    %14 = arith.cmpi ne, %13, %c0_i32_10 : i32
    scf.if %14 {
      %c0_11 = arith.constant 0 : index
      %c0_12 = arith.constant 0 : index
      %15 = vector.load %arg7[%c0_11, %c0_12] : memref<8x8xf32, #tpu.memory_space<vmem>>, vector<8x8xf32>
      %c0_13 = arith.constant 0 : index
      %c0_14 = arith.constant 0 : index
      %16 = vector.load %arg5[%c0_13, %c0_14] : memref<1x8xf32, #tpu.memory_space<vmem>>, vector<1x8xf32>
      %17 = vector.broadcast %16 : vector<1x8xf32> to vector<8x8xf32>
      %18 = arith.addf %15, %17 : vector<8x8xf32>
      %c0_15 = arith.constant 0 : index
      %c0_16 = arith.constant 0 : index
      %19 = vector.load %arg6[%c0_15, %c0_16] : memref<8x8xf32, #tpu.memory_space<vmem>>, vector<8x8xf32>
      tpu.vector_store %arg6[%c0_15, %c0_16], %18 {strides = array<i32>} : memref<8x8xf32, #tpu.memory_space<vmem>>, vector<8x8xf32>,
    } else {
    }
    return
  }
  func.func @transform_0(%arg0: i32, %arg1: i32, %arg2: i32) -> (i32, i32, i32) {
    %c0_i32 = arith.constant 0 : i32
    return %arg1, %arg0, %arg2 : i32, i32, i32
  }
  func.func @transform_1(%arg0: i32, %arg1: i32, %arg2: i32) -> (i32, i32) {
    %c0_i32 = arith.constant 0 : i32
    return %arg0, %arg2 : i32, i32
  }
  func.func @transform_2(%arg0: i32, %arg1: i32, %arg2: i32) -> (i32, i32) {
    %c0_i32 = arith.constant 0 : i32
    %c0_i32_0 = arith.constant 0 : i32
    return %c0_i32, %arg0 : i32, i32
  }
  func.func @transform_3(%arg0: i32, %arg1: i32, %arg2: i32) -> (i32, i32) {
    %c0_i32 = arith.constant 0 : i32
    return %arg1, %arg0 : i32, i32
  }
}

</mosaic_0001>

<bundles_post_ra>
// kernel: tpu_custom_call.1
= control target key start
LH: loop header
LB: loop body
LE: loop exit
PB: predicated region body
PF: predicated region fallthrough
CT: control target
= control target key end

     0   :  { %8 = vsyncpa [#allocation4], 0  ;;  %s301_s0 = inlined_call_operand.hbm [shape: f32[8,8,32], index: 0, kind: input, shape index: {}]   ;;  %s302_s1 = inlined_call_operand.hbm [shape: f32[8,32], index: 1, kind: input, shape index: {}]   ;;  %s303_s2 = inlined_call_operand.vmem [shape: f32[1,8], index: 2, kind: input, shape index: {}]   ;;  %s304_s3 = inlined_call_operand.hbm [shape: f32[8,8], index: 3, kind: output, shape index: {}]  }
   0x1   :  { %9 = vsyncpa [#allocation7], 0 }
   0x2   :  { %10 = vsyncpa [#allocation5], 0  ;;  %s252_s12 = smov [#allocation3]  }
   0x3   :  { %s16_s13 = sshll.u32 %s252_s12, 4  ;;  %s17_s13 = int_to_ptr.vmem [resolvable:$true] %s16_s13 }
   0x4   :  { %s194_s14 = scalar_lea.vmem %s17_s13, 1024  ;;  %p199_p1 = scmp.lt.s32.totalorder %s17_s13, %s17_s13 }
   0x5   :  { %p195_p0 = scmp.ne.s32.totalorder %s17_s13, %s194_s14  ;;  %p200_p2 = scmp.lt.s32.totalorder %s194_s14, %s194_s14 }
   0x7   :  { %p201_p3 = por %p200_p2, %p199_p1 }
   0x9   :  { %p202_p4 = pnand %p201_p3, %p195_p0 }
   0xb   :  { %205 = shalt.err (!%p202_p4)
}
   0xc   :  { %s253_s15 = smov 128   ;;  %s254_s16 = smov 8  }
   0xd   :  { %22 = dma.hbm_to_vmem [thread:$0]  %s301_s0, 1024, %s17_s13, [#allocation4], %s253_s15, %s253_s15, %s254_s16  }
   0xe   :  { %s255_s19 = smov [#allocation6]  }
   0xf   :  { %s29_s20 = sshll.u32 %s255_s19, 4  ;;  %s30_s20 = int_to_ptr.vmem [resolvable:$true] %s29_s20 }
  0x10   :  { %s214_s21 = scalar_lea.vmem %s30_s20, 128  ;;  %p219_p6 = scmp.lt.s32.totalorder %s30_s20, %s30_s20 }
  0x11   :  { %p215_p5 = scmp.ne.s32.totalorder %s30_s20, %s214_s21  ;;  %p220_p7 = scmp.lt.s32.totalorder %s214_s21, %s214_s21 }
  0x13   :  { %p221_p8 = por %p220_p7, %p219_p6 }
  0x15   :  { %p222_p9 = pnand %p221_p8, %p215_p5 }
  0x17   :  { %225 = shalt.err (!%p222_p9)
}
  0x18   :  { %32 = dma.hbm_to_vmem [thread:$0]  %s302_s1, 128, %s30_s20, [#allocation7]  }
  0x19   :  { %246 = dma.done.wait [#allocation4], 1024  }
  0x1a   :  { %247 = vsyncadd [#allocation4], 4294966272 }
  0x1b   :  { %248 = dma.done.wait [#allocation7], 128  }
  0x1c   :  { %249 = vsyncadd [#allocation7], 4294967168  ;;  %v47_v0 = vld [vmem:[#allocation3] sm:$0xff]  ;;  %vm65_vm0 = vcmask 261120   ;;  %v49_v2 = vld [vmem:[#allocation3 + $0x10] sm:$0xff]  ;;  %vm45_vm1 = vcmask 64512   ;;  %v98_v26 = vlaneseq }
  0x1d   :  { %v55_v1 = vld [vmem:[#allocation6] sm:$0xff]  ;;  %v48_v5 = vld [vmem:[#allocation3 + $0x8] sm:$0xff]  ;;  %v50_v6 = vld [vmem:[#allocation3 + $0x18] sm:$0xff]  ;;  %v256_v25 = vmov 0.0   ;;  %vm132_vm2 = vcmask 1041409   ;;  %vm134_vm3 = vcmask 1042434  }
  0x1e   :  { %v56_v3 = vmul.f32 %v55_v1, %v47_v0  ;;  %v58_v4 = vmul.f32 %v55_v1, %v49_v2  ;;  %v57_v7 = vmul.f32 %v55_v1, %v48_v5  ;;  %v59_v8 = vmul.f32 %v55_v1, %v50_v6  ;;  %v51_v9 = vld [vmem:[#allocation3 + $0x20] sm:$0xff]  ;;  %v52_v10 = vld [vmem:[#allocation3 + $0x28] sm:$0xff]  ;;  %v53_v17 = vld [vmem:[#allocation3 + $0x30] sm:$0xff]  ;;  %46 = vst.msk [vmem:[#allocation2] sm:$0xff] %vm45_vm1, %v256_v25  ;;  %s257_s24 = smov [#allocation8]  }
  0x1f   :  { %v60_v15 = vmul.f32 %v55_v1, %v51_v9  ;;  %v61_v16 = vmul.f32 %v55_v1, %v52_v10  ;;  %v54_v18 = vld [vmem:[#allocation3 + $0x38] sm:$0xff]  ;;  %v62_v21 = vmul.f32 %v55_v1, %v53_v17  ;;  %v99_v27 = vand.u32 127, %v98_v26  ;;  %s169_s25 = sshll.u32 %s257_s24, 4  ;;  %s170_s25 = int_to_ptr.vmem [resolvable:$true] %s169_s25 }
  0x20   :  { %v66_v11 = vsel %vm65_vm0, %v56_v3, 0.0  ;;  %v72_v12 = vsel %vm65_vm0, %v58_v4, 0.0  ;;  %v69_v13 = vsel %vm65_vm0, %v57_v7, 0.0  ;;  %v75_v14 = vsel %vm65_vm0, %v59_v8, 0.0  ;;  %v179_v55 = vld [vmem:[%s303_s2] ss:$0 sm:$0xff]  ;;  %p231_p11 = scmp.lt.s32.totalorder %s170_s25, %s170_s25 }
  0x21   :  { %67 = vadd.xlane.f32.xlu0 %v66_v11  ;;  %73 = vadd.xlane.f32.xlu1 %v72_v12  ;;  %v78_v19 = vsel %vm65_vm0, %v60_v15, 0.0  ;;  %v81_v20 = vsel %vm65_vm0, %v61_v16, 0.0  ;;  %v63_v22 = vmul.f32 %v55_v1, %v54_v18  ;;  %v84_v23 = vsel %vm65_vm0, %v62_v21, 0.0  ;;  %s226_s26 = scalar_lea.vmem %s170_s25, 128 }
  0x22   :  { %v101_v28 = vshrl.u32 %v98_v26, 7  ;;  %vm136_vm4 = vcmask 1043459   ;;  %vm138_vm5 = vcmask 1044484   ;;  %vm140_vm6 = vcmask 1045509   ;;  %p227_p10 = scmp.ne.s32.totalorder %s170_s25, %s226_s26  ;;  %p232_p12 = scmp.lt.s32.totalorder %s226_s26, %s226_s26 }
  0x23   :  { %v87_v24 = vsel %vm65_vm0, %v63_v22, 0.0  ;;  %vm142_vm7 = vcmask 1046534   ;;  %vm144_vm8 = vcmask 1047559  }
  0x24   :  { %v102_v31 = vsub.s32 %v99_v27, %v101_v28  ;;  %p233_p13 = por %p232_p12, %p231_p11 }
  0x25   :  { %70 = vadd.xlane.f32.xlu0 %v69_v13  ;;  %76 = vadd.xlane.f32.xlu1 %v75_v14  ;;  %v64_v51 = vld [vmem:[#allocation2] sm:$0xff] }
  0x26   :  { %p234_p0 = pnand %p233_p13, %p227_p10 }
  0x29   :  { %79 = vadd.xlane.f32.xlu0 %v78_v19  ;;  %82 = vadd.xlane.f32.xlu1 %v81_v20 }
  0x2d   :  { %85 = vadd.xlane.f32.xlu0 %v84_v23  ;;  %88 = vadd.xlane.f32.xlu1 %v87_v24 }
  0xaa   :  { %v68_v29 = vpop.xlane.xlu0 %67  ;;  %v74_v30 = vpop.xlane.xlu1 %73 }
  0xab   :  { %v103_v34 = vrot.slane %v68_v29, %v102_v31  ;;  %v111_v37 = vrot.slane %v74_v30, %v102_v31 }
  0xae   :  { %v71_v32 = vpop.xlane.xlu0 %70  ;;  %v77_v33 = vpop.xlane.xlu1 %76 }
  0xaf   :  { %v107_v35 = vrot.slane %v71_v32, %v102_v31  ;;  %v115_v36 = vrot.slane %v77_v33, %v102_v31 }
  0xb1   :  { %v133_v38 = vsel %vm132_vm2, %v107_v35, %v103_v34 }
  0xb2   :  { %v135_v39 = vsel %vm134_vm3, %v111_v37, %v133_v38  ;;  %v80_v40 = vpop.xlane.xlu0 %79  ;;  %v83_v41 = vpop.xlane.xlu1 %82 }
  0xb3   :  { %v137_v42 = vsel %vm136_vm4, %v115_v36, %v135_v39  ;;  %v119_v43 = vrot.slane %v80_v40, %v102_v31  ;;  %v123_v44 = vrot.slane %v83_v41, %v102_v31 }
  0xb5   :  { %v139_v45 = vsel %vm138_vm5, %v119_v43, %v137_v42 }
  0xb6   :  { %v86_v46 = vpop.xlane.xlu0 %85  ;;  %v89_v47 = vpop.xlane.xlu1 %88  ;;  %v141_v50 = vsel %vm140_vm6, %v123_v44, %v139_v45 }
  0xb7   :  { %v127_v48 = vrot.slane %v86_v46, %v102_v31  ;;  %v131_v49 = vrot.slane %v89_v47, %v102_v31 }
  0xb9   :  { %v143_v52 = vsel %vm142_vm7, %v127_v48, %v141_v50 }
  0xba   :  { %v145_v53 = vsel %vm144_vm8, %v131_v49, %v143_v52 }
  0xbb   :  { %v147_v54 = vadd.f32 %v145_v53, %v64_v51 }
  0xbd   :  { %149 = vst.msk [vmem:[#allocation2] sm:$0xff] %vm45_vm1, %v147_v54 }
  0xc4   :  { %v153_v56 = vld [vmem:[#allocation2] sm:$0xff] }
  0xc5   :  { %v161_v57 = vadd.f32 %v179_v55, %v153_v56 }
  0xc7   :  { %162 = vst.msk [vmem:[#allocation8] sm:$0xff] %vm45_vm1, %v161_v57 }
  0xc8   :  { %237 = shalt.err (!%p234_p0)
}
  0xc9   :  { %172 = dma.vmem_to_hbm [thread:$0]  %s170_s25, 128, %s304_s3, [#allocation5]  }
  0xca   :  { %250 = dma.done.wait [#allocation5], 128  }
  0xcb   :  { %251 = vsyncadd [#allocation5], 4294967168 }
  0xcc   :  { %176 = vsyncpa [#allocation4], 1 }
  0xcd   :  { %177 = vsyncpa [#allocation7], 1 }
  0xce   :  { %178 = vsyncpa [#allocation5], 1 }

</bundles_post_ra>
